<compile_context>
chip_gen: v6e
topology: v6e:2x2x1
jax: 0.10.0
libtpu: 0.0.40
codegen_flags: <defaults>
</compile_context>

<pallas_src>
import jax
import jax.numpy as jnp
from jax import lax
from jax.experimental import pallas as pl
from jax.experimental.pallas import tpu as pltpu

LAYER_NORM_EPS = 1e-7  # deberta-v2 default config.layer_norm_eps
KERNEL_SIZE = 3        # config.conv_kernel_size default


def _tpu_vmem_capacity_bytes():
    """Physical VMEM per core; conservative 64 MiB fallback if the query fails."""
    try:
        info = pltpu.get_tpu_info()
        cap = getattr(info, "vmem_capacity_bytes", None)
        if cap:
            return int(cap)
    except Exception:
        pass
    return 64 * 1024 * 1024


def _auto_seq_tile(L, B, vmem_cap_bytes):
    # Cap the seq tile on small-VMEM parts (v7x: 64 MiB) so the resident set
    # (2x 13.5 MiB weight buffers at H=1536 + activation tiles + f32 LN
    # temporaries) stays comfortably inside VMEM; 512 is fine on 128 MiB parts.
    max_tl = 256 if vmem_cap_bytes <= 64 * 1024 * 1024 else 512
    tl = L
    for t in (512, 256, 128, 64, 32, 16, 8):
        if t <= max_tl and L % t == 0:
            tl = t
            break
    # Guarantee >= 2 grid steps so both v7x TensorCores get work at tiny batch.
    while B * (L // tl) < 2 and tl > 8 and tl % 2 == 0 and L % (tl // 2) == 0:
        tl //= 2
    return tl


def _make_kernel(seq_tile, kernel_size, hidden_size, eps):
    TL, K, H = seq_tile, kernel_size, hidden_size
    pad = (K - 1) // 2
    inv_h = 1.0 / float(H)

    def kernel(mask_ref, hid_ref, res_ref, w_ref, b_ref, g_ref, beta_ref, o_ref):
        """One (batch, seq-tile) block per grid step.

        mask_ref: (1, TL, 1) f32        hid_ref: (1, L+2*pad, H) bf16 (padded, per-batch resident)
        res_ref: (1, TL, H) bf16        w_ref: (K, H, H) bf16 (tap-k RHS, [k, in, out])
        b/g/beta_ref: (1, H) f32        o_ref: (1, TL, H)
        """
        # --- Conv1d(kernel=K, padding=pad): K bf16 MXU matmuls, f32 accumulation ---
        t = pl.program_id(1)
        base = pl.multiple_of(t * TL, TL)                   # tile-aligned dynamic start
        slab = hid_ref[0, pl.ds(base, TL + 2 * pad), :]     # (TL+2*pad, H) bf16 halo slab

        conv = jnp.dot(slab[0:TL], w_ref[0], preferred_element_type=jnp.float32)
        for k in range(1, K):                               # static unroll (K == 3)
            conv = conv + jnp.dot(slab[k:k + TL], w_ref[k],
                                  preferred_element_type=jnp.float32)
        conv = conv + b_ref[...]                            # (TL, H) + (1, H)

        # --- masked_fill(rmask, 0) then tanh (tanh(0)=0 keeps the ordering valid;
        #     StableDropout is identity at inference) ---
        mask = mask_ref[0].astype(jnp.float32)              # (TL, 1)
        out = jnp.tanh(conv * mask)

        # --- residual add + LayerNorm over hidden dim (f32 tail, one-pass stats) ---
        ln_in = res_ref[0].astype(jnp.float32) + out
        s1 = jnp.sum(ln_in, axis=-1, keepdims=True)
        s2 = jnp.sum(ln_in * ln_in, axis=-1, keepdims=True)
        mean = s1 * inv_h
        var = jnp.maximum(s2 * inv_h - mean * mean, 0.0)
        normed = (ln_in - mean) * lax.rsqrt(var + eps)
        normed = normed * g_ref[...] + beta_ref[...]

        # --- output_states = output * input_mask.unsqueeze(2) ---
        o_ref[0] = (normed * mask).astype(o_ref.dtype)

    return kernel


def conv_layer_forward(hidden_states, residual_states, input_mask,
                       conv_weight, conv_bias, ln_gamma, ln_beta,
                       *, seq_tile=None, out_dtype=None):
    """hidden_states/residual_states: (B, L, H); input_mask: (B, L) 0/1.
    conv_weight: (H, H, K) torch layout (out, in, k); conv_bias/ln_gamma/ln_beta: (H,)."""
    B, L, H = hidden_states.shape
    K = conv_weight.shape[-1]
    assert K % 2 == 1, "Conv1d with padding=(K-1)//2 only preserves length for odd K"
    pad = (K - 1) // 2

    vmem_cap = _tpu_vmem_capacity_bytes()
    TL = seq_tile if seq_tile is not None else _auto_seq_tile(L, B, vmem_cap)
    assert L % TL == 0, f"seq_tile {TL} must divide L {L}"
    Lp = L + 2 * pad
    out_dtype = hidden_states.dtype if out_dtype is None else out_dtype

    # bf16 activations (MXU-native operands); all f32 math stays inside the kernel.
    xb = hidden_states.astype(jnp.bfloat16)
    x_pad = jnp.pad(xb, ((0, 0), (pad, pad), (0, 0)))        # (B, L+2*pad, H), zero halo
    res_b = residual_states.astype(jnp.bfloat16)             # inference-precision residual

    # w_all[k, i, o] = torch_weight[o, i, k]  ->  tap-k matmul RHS of shape (H_in, H_out)
    w_all = jnp.transpose(conv_weight, (2, 1, 0)).astype(jnp.bfloat16)
    bias2 = conv_bias.reshape(1, H).astype(jnp.float32)
    gamma2 = ln_gamma.reshape(1, H).astype(jnp.float32)
    beta2 = ln_beta.reshape(1, H).astype(jnp.float32)
    mask3 = input_mask.astype(jnp.float32).reshape(B, L, 1)

    kernel = _make_kernel(TL, K, H, LAYER_NORM_EPS)

    grid_spec = pltpu.PrefetchScalarGridSpec(
        num_scalar_prefetch=0,
        grid=(B, L // TL),
        in_specs=[
            pl.BlockSpec((1, TL, 1), lambda b, t: (b, t, 0)),      # mask
            # Padded hidden: whole (Lp, H) sequence resident per batch; constant
            # block index across the seq-tile axis so it is DMA'd once per batch
            # (~1.6 MiB bf16 at L=512, H=1536; x2 pipeline buffers).
            pl.BlockSpec((1, Lp, H), lambda b, t: (b, 0, 0)),
            pl.BlockSpec((1, TL, H), lambda b, t: (b, t, 0)),      # residual (bf16)
            # Grid-invariant conv weight: constant index_map -> fetched once, never
            # re-DMA'd. Two pipeline buffers stay reserved (2 x K*H*H bf16 = 27 MiB
            # at H=1536); the v7x TL cap budgets for that.
            # TODO(synk): single-buffer this via pipeline_mode=pl.Buffered(1) once
            # that path is verified on the main pallas_call pipeline.
            pl.BlockSpec((K, H, H), lambda b, t: (0, 0, 0)),
            pl.BlockSpec((1, H), lambda b, t: (0, 0)),             # conv bias
            pl.BlockSpec((1, H), lambda b, t: (0, 0)),             # LN gamma
            pl.BlockSpec((1, H), lambda b, t: (0, 0)),             # LN beta
        ],
        out_specs=pl.BlockSpec((1, TL, H), lambda b, t: (b, t, 0)),
    )

    # ~7/8 of physical VMEM: 112 MiB on 128 MiB parts (v5e/v6e), 56 MiB on v7x.
    vmem_limit = int(max(32 * 1024 * 1024, (vmem_cap * 7) // 8))

    return pl.pallas_call(
        kernel,
        out_shape=jax.ShapeDtypeStruct((B, L, H), out_dtype),
        grid_spec=grid_spec,
        compiler_params=pltpu.CompilerParams(
            dimension_semantics=("parallel", "parallel"),
            vmem_limit_bytes=vmem_limit,
        ),
    )(mask3, x_pad, res_b, w_all, bias2, gamma2, beta2)


def conv_layer_reference(hidden_states, residual_states, input_mask,
                         conv_weight, conv_bias, ln_gamma, ln_beta):
    """Pure-JAX f32 reference mirroring the PyTorch forward (inference)."""
    x_ncw = jnp.transpose(hidden_states, (0, 2, 1))                  # (B, H, L)
    pad = (KERNEL_SIZE - 1) // 2
    out = lax.conv_general_dilated(
        x_ncw, conv_weight, window_strides=(1,), padding=((pad, pad),),
        dimension_numbers=("NCH", "OIH", "NCH"))
    out = out + conv_bias[None, :, None]
    out = jnp.transpose(out, (0, 2, 1))                              # (B, L, H)
    m = input_mask.astype(out.dtype)[:, :, None]
    out = out * m
    out = jnp.tanh(out)
    ln_in = residual_states + out
    mean = ln_in.mean(-1, keepdims=True)
    var = ((ln_in - mean) ** 2).mean(-1, keepdims=True)
    o = (ln_in - mean) / jnp.sqrt(var + LAYER_NORM_EPS) * ln_gamma + ln_beta
    return o * m


if __name__ == "__main__":
    B, L, H = 2, 32, 32

    key = jax.random.PRNGKey(0)
    k_x, k_r, k_m, k_w, k_b, k_g, k_be = jax.random.split(key, 7)

    hidden_states = jax.random.normal(k_x, (B, L, H), jnp.float32)
    residual_states = jax.random.normal(k_r, (B, L, H), jnp.float32)
    # 0/1 attention mask (keep ~70% of positions, ensure first token kept)
    input_mask = (jax.random.uniform(k_m, (B, L)) > 0.3).astype(jnp.int32)
    input_mask = input_mask.at[:, 0].set(1)

    # Shapes match nn.Conv1d(H, H, 3) and LayerNorm(H)
    conv_weight = 0.1 * jax.random.normal(k_w, (H, H, KERNEL_SIZE), jnp.float32)
    conv_bias = 0.1 * jax.random.normal(k_b, (H,), jnp.float32)
    ln_gamma = 1.0 + 0.05 * jax.random.normal(k_g, (H,), jnp.float32)
    ln_beta = 0.05 * jax.random.normal(k_be, (H,), jnp.float32)

    ref = conv_layer_reference(hidden_states, residual_states, input_mask,
                               conv_weight, conv_bias, ln_gamma, ln_beta)

    # Loose tolerance: conv operands and the residual are carried in bf16
    # (f32 accumulation / LN math), while the reference runs in full f32.
    TOL = dict(atol=3e-2, rtol=3e-2)

    # seq_tile=16 -> grid (2, 2): exercises the seq-tiling + halo-slab path.
    out = conv_layer_forward(hidden_states, residual_states, input_mask,
                             conv_weight, conv_bias, ln_gamma, ln_beta,
                             seq_tile=16)
    out = jax.block_until_ready(out)
    assert out.shape == (B, L, H)
    assert jnp.allclose(out, ref, **TOL), "tiled-path mismatch vs JAX reference"

    # Default (generation-aware) tile selection path.
    out2 = conv_layer_forward(hidden_states, residual_states, input_mask,
                              conv_weight, conv_bias, ln_gamma, ln_beta)
    out2 = jax.block_until_ready(out2)
    assert jnp.allclose(out2, ref, **TOL), "auto-tile path mismatch vs JAX reference"

    print("KERNEL_OK")
</pallas_src>

<mosaic_0001>
module attributes {stable_mosaic.version = 11 : i64} {
  func.func @kernel(%arg0: i32, %arg1: i32, %arg2: memref<1x16x1xf32, #tpu.memory_space<vmem>>, %arg3: memref<1x34x32xbf16, #tpu.memory_space<vmem>>, %arg4: memref<1x16x32xbf16, #tpu.memory_space<vmem>>, %arg5: memref<3x32x32xbf16, #tpu.memory_space<vmem>>, %arg6: memref<1x32xf32, #tpu.memory_space<vmem>>, %arg7: memref<1x32xf32, #tpu.memory_space<vmem>>, %arg8: memref<1x32xf32, #tpu.memory_space<vmem>>, %arg9: memref<1x16x32xf32, #tpu.memory_space<vmem>>) attributes {dimension_semantics = [#tpu.dimension_semantics<parallel>, #tpu.dimension_semantics<parallel>], iteration_bounds = array<i64: 2, 2>, scalar_prefetch = 0 : i64, scratch_operands = 0 : i64, tpu.core_type = #tpu.core_type<tc>, window_params = [{transform_indices = @transform_0, window_bounds = array<i64: 1, 16, 1>}, {transform_indices = @transform_1, window_bounds = array<i64: 1, 34, 32>}, {transform_indices = @transform_2, window_bounds = array<i64: 1, 16, 32>}, {pipeline_mode = #tpu.pipeline_mode<synchronous>, transform_indices = @transform_3, window_bounds = array<i64: 3, 32, 32>}, {pipeline_mode = #tpu.pipeline_mode<synchronous>, transform_indices = @transform_4, window_bounds = array<i64: 1, 32>}, {pipeline_mode = #tpu.pipeline_mode<synchronous>, transform_indices = @transform_5, window_bounds = array<i64: 1, 32>}, {pipeline_mode = #tpu.pipeline_mode<synchronous>, transform_indices = @transform_6, window_bounds = array<i64: 1, 32>}, {transform_indices = @transform_7, window_bounds = array<i64: 1, 16, 32>}]} {
    %c16_i32 = arith.constant 16 : i32
    %0 = arith.muli %arg1, %c16_i32 : i32
    %1 = tpu.assume_multiple %0, 16 : i32
    %c0 = arith.constant 0 : index
    %2 = arith.index_cast %1 : i32 to index
    %c0_0 = arith.constant 0 : index
    %3 = vector.load %arg3[%c0, %2, %c0_0] : memref<1x34x32xbf16, #tpu.memory_space<vmem>>, vector<1x18x32xbf16>
    %4 = vector.shape_cast %3 : vector<1x18x32xbf16> to vector<18x32xbf16>
    %5 = vector.extract_strided_slice %4 {offsets = [0, 0], sizes = [16, 32], strides = [1, 1]} : vector<18x32xbf16> to vector<16x32xbf16>
    %c0_1 = arith.constant 0 : index
    %c0_2 = arith.constant 0 : index
    %c0_3 = arith.constant 0 : index
    %6 = vector.load %arg5[%c0_1, %c0_2, %c0_3] : memref<3x32x32xbf16, #tpu.memory_space<vmem>>, vector<1x32x32xbf16>
    %7 = vector.shape_cast %6 : vector<1x32x32xbf16> to vector<32x32xbf16>
    %cst = arith.constant dense<0.000000e+00> : vector<16x32xf32>
    %8 = tpu.matmul %5, %7, %cst {dimension_numbers = #tpu.dot_dimension_numbers<[1], [0], [0], [1], [0, 0, 1, 1], [], []>} : vector<16x32xbf16>, vector<32x32xbf16>, vector<16x32xf32> -> vector<16x32xf32>
    %9 = vector.extract_strided_slice %4 {offsets = [1, 0], sizes = [16, 32], strides = [1, 1]} : vector<18x32xbf16> to vector<16x32xbf16>
    %c1 = arith.constant 1 : index
    %c0_4 = arith.constant 0 : index
    %c0_5 = arith.constant 0 : index
    %10 = vector.load %arg5[%c1, %c0_4, %c0_5] : memref<3x32x32xbf16, #tpu.memory_space<vmem>>, vector<1x32x32xbf16>
    %11 = vector.shape_cast %10 : vector<1x32x32xbf16> to vector<32x32xbf16>
    %cst_6 = arith.constant dense<0.000000e+00> : vector<16x32xf32>
    %12 = tpu.matmul %9, %11, %cst_6 {dimension_numbers = #tpu.dot_dimension_numbers<[1], [0], [0], [1], [0, 0, 1, 1], [], []>} : vector<16x32xbf16>, vector<32x32xbf16>, vector<16x32xf32> -> vector<16x32xf32>
    %13 = arith.addf %8, %12 : vector<16x32xf32>
    %14 = vector.extract_strided_slice %4 {offsets = [2, 0], sizes = [16, 32], strides = [1, 1]} : vector<18x32xbf16> to vector<16x32xbf16>
    %c2 = arith.constant 2 : index
    %c0_7 = arith.constant 0 : index
    %c0_8 = arith.constant 0 : index
    %15 = vector.load %arg5[%c2, %c0_7, %c0_8] : memref<3x32x32xbf16, #tpu.memory_space<vmem>>, vector<1x32x32xbf16>
    %16 = vector.shape_cast %15 : vector<1x32x32xbf16> to vector<32x32xbf16>
    %cst_9 = arith.constant dense<0.000000e+00> : vector<16x32xf32>
    %17 = tpu.matmul %14, %16, %cst_9 {dimension_numbers = #tpu.dot_dimension_numbers<[1], [0], [0], [1], [0, 0, 1, 1], [], []>} : vector<16x32xbf16>, vector<32x32xbf16>, vector<16x32xf32> -> vector<16x32xf32>
    %18 = arith.addf %13, %17 : vector<16x32xf32>
    %c0_10 = arith.constant 0 : index
    %c0_11 = arith.constant 0 : index
    %19 = vector.load %arg6[%c0_10, %c0_11] : memref<1x32xf32, #tpu.memory_space<vmem>>, vector<1x32xf32>
    %20 = vector.broadcast %19 : vector<1x32xf32> to vector<16x32xf32>
    %21 = arith.addf %18, %20 : vector<16x32xf32>
    %c0_12 = arith.constant 0 : index
    %c0_13 = arith.constant 0 : index
    %c0_14 = arith.constant 0 : index
    %22 = vector.load %arg2[%c0_12, %c0_13, %c0_14] : memref<1x16x1xf32, #tpu.memory_space<vmem>>, vector<1x16x1xf32>
    %23 = vector.shape_cast %22 : vector<1x16x1xf32> to vector<16x1xf32>
    %24 = vector.broadcast %23 : vector<16x1xf32> to vector<16x32xf32>
    %25 = arith.mulf %21, %24 : vector<16x32xf32>
    %26 = math.tanh %25 : vector<16x32xf32>
    %c0_15 = arith.constant 0 : index
    %c0_16 = arith.constant 0 : index
    %c0_17 = arith.constant 0 : index
    %27 = vector.load %arg4[%c0_15, %c0_16, %c0_17] : memref<1x16x32xbf16, #tpu.memory_space<vmem>>, vector<1x16x32xbf16>
    %28 = vector.shape_cast %27 : vector<1x16x32xbf16> to vector<16x32xbf16>
    %29 = arith.extf %28 : vector<16x32xbf16> to vector<16x32xf32>
    %30 = arith.addf %29, %26 : vector<16x32xf32>
    %cst_18 = arith.constant dense<0.000000e+00> : vector<16xf32>
    %31 = vector.multi_reduction <add>, %30, %cst_18 [1] : vector<16x32xf32> to vector<16xf32>
    %32 = vector.shape_cast %31 : vector<16xf32> to vector<16x1xf32>
    %33 = arith.mulf %30, %30 : vector<16x32xf32>
    %cst_19 = arith.constant dense<0.000000e+00> : vector<16xf32>
    %34 = vector.multi_reduction <add>, %33, %cst_19 [1] : vector<16x32xf32> to vector<16xf32>
    %35 = vector.shape_cast %34 : vector<16xf32> to vector<16x1xf32>
    %cst_20 = arith.constant 3.125000e-02 : f32
    %36 = vector.broadcast %cst_20 : f32 to vector<16x1xf32>
    %37 = arith.mulf %32, %36 : vector<16x1xf32>
    %cst_21 = arith.constant 3.125000e-02 : f32
    %38 = vector.broadcast %cst_21 : f32 to vector<16x1xf32>
    %39 = arith.mulf %35, %38 : vector<16x1xf32>
    %40 = arith.mulf %37, %37 : vector<16x1xf32>
    %41 = arith.subf %39, %40 : vector<16x1xf32>
    %cst_22 = arith.constant 0.000000e+00 : f32
    %42 = vector.broadcast %cst_22 : f32 to vector<16x1xf32>
    %43 = arith.maximumf %41, %42 : vector<16x1xf32>
    %44 = vector.broadcast %37 : vector<16x1xf32> to vector<16x32xf32>
    %45 = arith.subf %30, %44 : vector<16x32xf32>
    %cst_23 = arith.constant 1.000000e-07 : f32
    %46 = vector.broadcast %cst_23 : f32 to vector<16x1xf32>
    %47 = arith.addf %43, %46 : vector<16x1xf32>
    %48 = math.rsqrt %47 : vector<16x1xf32>
    %49 = vector.broadcast %48 : vector<16x1xf32> to vector<16x32xf32>
    %50 = arith.mulf %45, %49 : vector<16x32xf32>
    %c0_24 = arith.constant 0 : index
    %c0_25 = arith.constant 0 : index
    %51 = vector.load %arg7[%c0_24, %c0_25] : memref<1x32xf32, #tpu.memory_space<vmem>>, vector<1x32xf32>
    %52 = vector.broadcast %51 : vector<1x32xf32> to vector<16x32xf32>
    %53 = arith.mulf %50, %52 : vector<16x32xf32>
    %c0_26 = arith.constant 0 : index
    %c0_27 = arith.constant 0 : index
    %54 = vector.load %arg8[%c0_26, %c0_27] : memref<1x32xf32, #tpu.memory_space<vmem>>, vector<1x32xf32>
    %55 = vector.broadcast %54 : vector<1x32xf32> to vector<16x32xf32>
    %56 = arith.addf %53, %55 : vector<16x32xf32>
    %57 = vector.broadcast %23 : vector<16x1xf32> to vector<16x32xf32>
    %58 = arith.mulf %56, %57 : vector<16x32xf32>
    %c0_28 = arith.constant 0 : index
    %c0_29 = arith.constant 0 : index
    %c0_30 = arith.constant 0 : index
    %59 = vector.load %arg9[%c0_28, %c0_29, %c0_30] : memref<1x16x32xf32, #tpu.memory_space<vmem>>, vector<1x16x32xf32>
    %60 = vector.shape_cast %59 : vector<1x16x32xf32> to vector<16x32xf32>
    %61 = vector.shape_cast %58 : vector<16x32xf32> to vector<1x16x32xf32>
    tpu.vector_store %arg9[%c0_28, %c0_29, %c0_30], %61 {strides = array<i32>} : memref<1x16x32xf32, #tpu.memory_space<vmem>>, vector<1x16x32xf32>,
    return
  }
  func.func @transform_0(%arg0: i32, %arg1: i32) -> (i32, i32, i32) {
    %c0_i32 = arith.constant 0 : i32
    %c0_i32_0 = arith.constant 0 : i32
    return %arg0, %arg1, %c0_i32 : i32, i32, i32
  }
  func.func @transform_1(%arg0: i32, %arg1: i32) -> (i32, i32, i32) {
    %c0_i32 = arith.constant 0 : i32
    %c0_i32_0 = arith.constant 0 : i32
    %c0_i32_1 = arith.constant 0 : i32
    return %arg0, %c0_i32, %c0_i32_0 : i32, i32, i32
  }
  func.func @transform_2(%arg0: i32, %arg1: i32) -> (i32, i32, i32) {
    %c0_i32 = arith.constant 0 : i32
    %c0_i32_0 = arith.constant 0 : i32
    return %arg0, %arg1, %c0_i32 : i32, i32, i32
  }
  func.func @transform_3(%arg0: i32, %arg1: i32) -> (i32, i32, i32) {
    %c0_i32 = arith.constant 0 : i32
    %c0_i32_0 = arith.constant 0 : i32
    %c0_i32_1 = arith.constant 0 : i32
    %c0_i32_2 = arith.constant 0 : i32
    return %c0_i32, %c0_i32_0, %c0_i32_1 : i32, i32, i32
  }
  func.func @transform_4(%arg0: i32, %arg1: i32) -> (i32, i32) {
    %c0_i32 = arith.constant 0 : i32
    %c0_i32_0 = arith.constant 0 : i32
    %c0_i32_1 = arith.constant 0 : i32
    return %c0_i32, %c0_i32_0 : i32, i32
  }
  func.func @transform_5(%arg0: i32, %arg1: i32) -> (i32, i32) {
    %c0_i32 = arith.constant 0 : i32
    %c0_i32_0 = arith.constant 0 : i32
    %c0_i32_1 = arith.constant 0 : i32
    return %c0_i32, %c0_i32_0 : i32, i32
  }
  func.func @transform_6(%arg0: i32, %arg1: i32) -> (i32, i32) {
    %c0_i32 = arith.constant 0 : i32
    %c0_i32_0 = arith.constant 0 : i32
    %c0_i32_1 = arith.constant 0 : i32
    return %c0_i32, %c0_i32_0 : i32, i32
  }
  func.func @transform_7(%arg0: i32, %arg1: i32) -> (i32, i32, i32) {
    %c0_i32 = arith.constant 0 : i32
    %c0_i32_0 = arith.constant 0 : i32
    return %arg0, %arg1, %c0_i32 : i32, i32, i32
  }
}

</mosaic_0001>

<bundles_post_ra>
// kernel: tpu_custom_call.1
= control target key start
LH: loop header
LB: loop body
LE: loop exit
PB: predicated region body
PF: predicated region fallthrough
CT: control target
= control target key end

     0   :  { %12 = vsyncpa [#allocation3], 0  ;;  %s1307_s0 = inlined_call_operand.vmem [shape: f32[2,32,1], index: 0, kind: input, shape index: {}]   ;;  %s1308_s1 = inlined_call_operand.vmem [shape: bf16[2,34,32], index: 1, kind: input, shape index: {}]   ;;  %s1309_s2 = inlined_call_operand.vmem [shape: bf16[2,32,32], index: 2, kind: input, shape index: {}]   ;;  %s1310_s3 = inlined_call_operand.vmem [shape: bf16[3,32,32], index: 3, kind: input, shape index: {}]   ;;  %s1311_s4 = inlined_call_operand.vmem [shape: f32[1,32], index: 4, kind: input, shape index: {}]   ;;  %s1312_s5 = inlined_call_operand.vmem [shape: f32[1,32], index: 5, kind: input, shape index: {}]   ;;  %s1313_s6 = inlined_call_operand.vmem [shape: f32[1,32], index: 6, kind: input, shape index: {}]   ;;  %s1314_s7 = inlined_call_operand.hbm [shape: f32[2,32,32], index: 7, kind: output, shape index: {}]  }
   0x1   :  { %14 = vsyncpa [#allocation3 + $0x1], 0  ;;  %s1111_s24 = smov 0   ;;  %s1113_s25 = smov 0  }
   0x2   :  { %s1115_s26 = smov 0   ;;  %s1117_s27 = smov 0  }
   0x3   :  { %s1119_s28 = smov 0   ;;  %s1121_s29 = smov 0  }
   0x4   :  { %s1123_s30 = smov 0   ;;  %s1125_s8 = smov 0  }
   0x5 LB: > { %s797_s9 = sadd.s32 4294967295, %s1063_s8   ;;  %s798_s10 = sadd.s32 4294967294, %s1063_s8   ;;  %s1063_s8 = sphi %s1125_s8, %s20_s8   ;;  %s1059_s30 = sphi %s1123_s30, %s1326_s30   ;;  %s1055_s29 = sphi %s1121_s29, %s1325_s29   ;;  %s1051_s28 = sphi %s1119_s28, %s1324_s28   ;;  %s1047_s27 = sphi %s1117_s27, %s1323_s27   ;;  %s1043_s26 = sphi %s1115_s26, %s1322_s26   ;;  %s1039_s25 = sphi %s1113_s25, %s1321_s25   ;;  %s1035_s24 = sphi %s1111_s24, %s1320_s24  }
   0x6   : > { %s29_s11 = sadd.s32 1, %s1055_s29  ;;  %s32_s12 = sadd.s32 1, %s1059_s30 }
   0x7   : > { %p30_p0 = scmp.ge.s32.totalorder %s29_s11, 2  ;;  %p217_p1 = scmp.ne.s32.totalorder %s1043_s26, %s1039_s25 }
   0x8   : > { %p218_p2 = scmp.eq.s32.totalorder %s797_s9, 3  ;;  %p223_p5 = scmp.ne.s32.totalorder %s1039_s25, %s1035_s24 }
   0x9   : > { %s1328_s11 = smov (%p30_p0, %s29_s11), 0  ;;  %s1330_s12 = smov (!%p30_p0, %s32_s12), %s1059_s30 }
   0xa   : > { %s203_s13 = ssub.s32 %s1055_s29, %s1328_s11  ;;  %p1162_p3 = por %p218_p2, %p217_p1 }
   0xb   : > { %p34_p4 = scmp.ge.s32.totalorder %s1330_s12, 2  ;;  %p224_p6 = scmp.eq.s32.totalorder %s798_s10, 3 }
   0xc   : > { %p801_p7 = scmp.ge.s32.totalorder %s1063_s8, 1  ;;  %p288_p9 = scmp.lt.s32.totalorder %s1063_s8, 5 }
   0xd   : > { %s1332_s12 = smov (%p34_p4, %s1330_s12), 0  ;;  %p1171_p8 = por %p224_p6, %p223_p5 }
   0xe   : > { %1317 = sst [smem:[#allocation5_spill]] %s1332_s12  ;;  %s202_s16 = ssub.s32 %s1059_s30, %s1332_s12 }
   0xf   : > { %s207_s17 = sadd.s32 1, %s1043_s26  ;;  %s204_s18 = sor.u32 %s203_s13, %s202_s16 }
  0x10   : > { %p289_p10 = pnand %p801_p7, %p288_p9  ;;  %p205_p11 = scmp.eq.s32.totalorder %s204_s18, 0 }
  0x11   : > { %p339_p12 = scmp.lt.s32.totalorder (!%p289_p10), %s1051_s28, 1  ;;  %s1200_s23 = sshll.u32 (!%p289_p10), %s1047_s27, 1 }
  0x12   : > { %s1180_s19 = scalar_select %p205_p11, %s1043_s26, %s207_s17  }
  0x13   : > { %292 = sbr.rel (%p289_p10) target bundleno = 452 (0x1c4), region = 48  ;;  %s810_s17 = sshll.u32 (!%p289_p10), %s1047_s27, 4 }
  0x14   : > { %s366_s20 = sshra.s32 (!%p289_p10), %s810_s17, 3  ;;  %p341_p13 = scmp.lt.s32.totalorder (!%p289_p10), %s1200_s23, 3 }
  0x15   : > { %s811_s22 = sshll.u32 (!%p289_p10), %s366_s20, 2  ;;  %s335_s10 = sand.u32 (!%p289_p10), 1, %s1039_s25  }
  0x18   : > { %v955_v0 = vld [vmem:[%s1310_s3 + $0x18] sm:$0xff]   ;;  %v1065_v1 = vmov 0.0   ;;  %v956_v2 = vld [vmem:[%s1310_s3 + $0x8] sm:$0xff]   ;;  %v957_v3 = vld [vmem:[%s1310_s3 + $0x10] sm:$0xff]   ;;  %vm1066_vm0 = vmmov 0   ;;  %s340_s18 = scalar_select %p339_p12, %s1051_s28, 1 }
  0x19   : > { %853 = vmatprep.subr.bf16.mxu0 %v1065_v1  ;;  %861 = vmatprep.subr.bf16.mxu1 %v1065_v1  ;;  %v958_v4 = vld [vmem:[%s1310_s3] sm:$0xff]   ;;  %v1067_v5 = vmov 0   ;;  %vm415_vm1 = vcmask 261120   ;;  %s342_s17 = scalar_select %p341_p13, %s1200_s23, 3  ;;  %vm390_vm2 = vsmask.f32 7424 }
  0x1a   : > { %854 = vmatpush3.bf16.msra.mxu0 %v955_v0  ;;  %857 = vmatprep.mubr.msk.bf16.mxu0 %vm1066_vm0, %v1065_v1  ;;  %s877_s21 = smul.u32 20, %s340_s18  ;;  %s804_s12 = sshll.u32 %s340_s18, 2  ;;  %v961_v15 = vld [vmem:[%s1310_s3 + $0x28] sm:$0xff]   ;;  %v962_v18 = vld [vmem:[%s1310_s3 + $0x20] sm:$0xff]   ;;  %vm520_vm3 = vcmask 1046528  }
  0x1b   : > { %862 = vmatpush3.bf16.msra.mxu1 %v956_v2  ;;  %855 = vmatprep.subr.bf16.mxu0 %v1065_v1  ;;  %s1208_s27 = sadd.s32 %s804_s12, %s342_s17  ;;  %v831_v32 = vld [vmem:[%s1311_s4] ss:$0 sm:$0xff]  ;;  %s836_s12 = sshll.u32 %s1051_s28, 2 }
  0x1c   : > { %863 = vmatprep.subr.bf16.mxu1 %v1065_v1  ;;  %865 = vmatprep.mubr.msk.bf16.mxu1 %vm1066_vm0, %v1065_v1  ;;  %s352_s13 = scalar_lea.vmem %s1308_s1, %s877_s21  ;;  %s805_s20 = sshll.u32 %s1208_s27, 3 }
  0x1d   : > { %954 = vset.pattern.permute.xlu0 %v1067_v5  ;;  %s369_s16 = scalar_lea.vmem %s352_s13, %s811_s22  ;;  %s346_s22 = scalar_lea.vmem %s1307_s0, %s805_s20 }
  0x1e   : > { %856 = vmatpush3.bf16.msra.mxu0 %v957_v3  ;;  %v959_v6 = vld [vmem:[%s369_s16] sm:$0xff]   ;;  %v960_v7 = vld [vmem:[%s369_s16 + $0x8] ss:$0 sps:$4 sm:$0x11]   ;;  %s809_s20 = sshll.u32 %s1208_s27, 2  ;;  %s802_s17 = sshll.u32 %s335_s10, 4 }
  0x1f   : > { %864 = vmatpush3.bf16.msra.mxu1 %v958_v4  ;;  %869 = vmatprep.subr.bf16.mxu0 %v1065_v1  ;;  %v392_v8 = vshrl.u32 %v959_v6, 16  ;;  %v394_v9 = vshll.u32 %v959_v6, 16  ;;  %v399_v10 = vshll.u32 %v960_v7, 16  ;;  %v591_v13 = vld [vmem:[%s346_s22] sm:$0xff]  ;;  %v592_v17 = vld [vmem:[%s346_s22 + $0x8] sm:$0xff]  ;;  %v521_v19 = vrot.slane %v959_v6, 1  ;;  %s361_s22 = scalar_lea.vmem %s1309_s2, %s809_s20  ;;  %s680_s20 = sadd.s32 %s836_s12, %s1200_s23 }
  0x20   : > { %595 = vperm.xlu0 %954, %v591_v13   ;;  %v522_v20 = vrot.slane %v960_v7, 1  ;;  %v841_v45 = vld [vmem:[%s361_s22] sm:$0xff]   ;;  %s837_s21 = sshll.u32 %s680_s20, 7  ;;  %s337_s9 = scalar_lea.vmem [#allocation2], %s802_s17 }
  0x21   : > { %v396_v11 = vrot.slane %v394_v9, 1  ;;  %v401_v12 = vrot.slane %v399_v10, 1  ;;  %v842_v46 = vunpack.c.l.bf16 %v841_v45  ;;  %v843_v48 = vunpack.c.h.bf16 %v841_v45  ;;  %s683_s28 = sshll.u32 %s337_s9, 4  ;;  %s1251_s18 = scalar_lea.hbm %s1314_s7, %s837_s21  ;;  %s1253_s28 = int_to_ptr.vmem [resolvable:$true] %s683_s28 }
  0x22   : > { %866 = vmatmul.mubr.msk.bf16.vlgmr.msra.gmra.mxu1 %vm415_vm1, %v959_v6  ;;  %v523_v21 = vsel %vm520_vm3, %v521_v19, %v522_v20  ;;  %s1256_s23 = scalar_lea.sflag [#allocation3], %s335_s10  ;;  %s971_s12 = scalar_lea.vmem %s1253_s28, 256 }
  0x23   : > { %v397_v14 = vor.u32 %v396_v11, %v392_v8  ;;  %p972_p0 = scmp.ne.s32.totalorder %s1253_s28, %s971_s12  ;;  %s1068_s13 = smov [#allocation2]  }
  0x24   : > { %600 = vperm.xlu0 %954, %v592_v17   ;;  %s975_s16 = sshll.u32 %s1068_s13, 4  ;;  %s976_s16 = int_to_ptr.vmem [resolvable:$false] %s975_s16 }
  0x25   : > { %v402_v16 = vsel %vm390_vm2, %v397_v14, %v401_v12  ;;  %v832_v12 = vld [vmem:[%s1312_s5] ss:$0 sm:$0xff]  ;;  %p973_p1 = pnand %p972_p0, %p1162_p3  ;;  %s977_s17 = scalar_lea.vmem %s976_s16, 512 }
  0x26   : > { %858 = vmatmul.mubr.msk.bf16.vlgmr.msra.gmra.mxu0 %vm415_vm1, %v402_v16  ;;  %v833_v14 = vld [vmem:[%s1313_s6] ss:$0 sm:$0xff]  ;;  %p978_p4 = scmp.lt.s32.totalorder %s1253_s28, %s976_s16  ;;  %p979_p5 = scmp.lt.s32.totalorder %s977_s17, %s971_s12 }
  0x27   : > { %870 = vmatpush3.bf16.msra.mxu0 %v961_v15  ;;  %873 = vmatprep.mubr.msk.bf16.mxu0 %vm1066_vm0, %v1065_v1  ;;  %p974_p2 = pneg %p973_p1 }
  0x28   : > { %871 = vmatprep.subr.bf16.mxu0 %v1065_v1  ;;  %p980_p6 = por %p979_p5, %p978_p4 }
  0x2a   : > { %p981_p7 = pnand %p980_p6, %p974_p2 }
  0x2b   : > { %872 = vmatpush3.bf16.msra.mxu0 %v962_v18 }
  0x2e   : > { %874 = vmatmul.mubr.msk.bf16.vlgmr.msra.gmra.mxu0 %vm415_vm1, %v523_v21 }
  0x9b   : > { %v1226_v34 = vpop.permute.xlu0 %595 }
  0x9f   : > { %v601_v43 = vpop.permute.xlu0 %600 }
  0xe2   : > { %v508_v22 = vpop.f32.mrf.mxu1 }
  0xe4   : > { %v867_v23 = vpop.f32.mrf.mxu1 }
  0xe6   : > { %v511_v24 = vpop.f32.mrf.mxu1  ;;  %v453_v26 = vpop.f32.mrf.mxu0 }
  0xe7   : > { %v509_v30 = vadd.f32 %v508_v22, %v453_v26 }
  0xe8   : > { %v868_v25 = vpop.f32.mrf.mxu1  ;;  %v859_v27 = vpop.f32.mrf.mxu0 }
  0xea   : > { %v456_v28 = vpop.f32.mrf.mxu0 }
  0xeb   : > { %v512_v36 = vadd.f32 %v511_v24, %v456_v28 }
  0xec   : > { %v860_v29 = vpop.f32.mrf.mxu0 }
  0xee   : > { %v573_v31 = vpop.f32.mrf.mxu0 }
  0xef   : > { %v580_v33 = vadd.f32 %v573_v31, %v509_v30 }
  0xf0   : > { %v875_v35 = vpop.f32.mrf.mxu0 }
  0xf1   : > { %v589_v37 = vadd.f32 %v831_v32, %v580_v33 }
  0xf2   : > { %v576_v38 = vpop.f32.mrf.mxu0 }
  0xf3   : > { %v603_v39 = vmul.f32 %v1226_v34, %v589_v37  ;;  %v581_v40 = vadd.f32 %v576_v38, %v512_v36 }
  0xf4   : > { %v876_v41 = vpop.f32.mrf.mxu0 }
  0xf5   : > { %963 = vtanh.f32 %v603_v39  ;;  %v590_v42 = vadd.f32 %v831_v32, %v581_v40 }
  0xf7   : > { %v604_v44 = vmul.f32 %v601_v43, %v590_v42 }
  0xf9   : > { %965 = vtanh.f32 %v604_v44 }
 0x102   : > { %v964_v47 = vpop.eup %963 }
 0x103   : > { %v611_v49 = vadd.f32 %v964_v47, %v842_v46 }
 0x105   : > { %v613_v50 = vsel %vm415_vm1, %v611_v49, 0.0  ;;  %v619_v51 = vmul.f32 %v611_v49, %v611_v49 }
 0x106   : > { %v966_v52 = vpop.eup %965  ;;  %614 = vadd.xlane.f32.xlu1 %v613_v50 }
 0x107   : > { %v621_v53 = vsel %vm415_vm1, %v619_v51, 0.0  ;;  %v612_v54 = vadd.f32 %v966_v52, %v843_v48 }
 0x108   : > { %622 = vadd.xlane.f32.xlu0 %v621_v53 }
 0x109   : > { %v616_v55 = vsel %vm415_vm1, %v612_v54, 0.0  ;;  %v620_v56 = vmul.f32 %v612_v54, %v612_v54 }
 0x10a   : > { %617 = vadd.xlane.f32.xlu1 %v616_v55 }
 0x10b   : > { %v624_v57 = vsel %vm415_vm1, %v620_v56, 0.0 }
 0x10e   : > { %625 = vadd.xlane.f32.xlu1 %v624_v57 }
 0x18f   : > { %v615_v58 = vpop.xlane.xlu1 %614 }
 0x190   : > { %v627_v59 = vmul.f32 0.03125, %v615_v58 }
 0x191   : > { %v623_v60 = vpop.xlane.xlu0 %622 }
 0x192   : > { %v631_v61 = vmul.f32 %v627_v59, %v627_v59  ;;  %v629_v62 = vmul.f32 0.03125, %v623_v60  ;;  %v637_v10 = vsub.f32 %v611_v49, %v627_v59 }
 0x193   : > { %v618_v63 = vpop.xlane.xlu1 %617 }
 0x194   : > { %v633_v0 = vsub.f32 %v629_v62, %v631_v61  ;;  %v628_v1 = vmul.f32 0.03125, %v618_v63 }
 0x196   : > { %v635_v2 = vmax.f32 %v633_v0, 0.0  ;;  %v632_v5 = vmul.f32 %v628_v1, %v628_v1  ;;  %v638_v16 = vsub.f32 %v612_v54, %v628_v1 }
 0x197   : > { %v626_v3 = vpop.xlane.xlu1 %625 }
 0x198   : > { %v639_v4 = vadd.f32 1e-07, %v635_v2  ;;  %v630_v6 = vmul.f32 0.03125, %v626_v3 }
 0x19a   : > { %967 = vrsqrt.f32 %v639_v4  ;;  %v634_v7 = vsub.f32 %v630_v6, %v632_v5 }
 0x19c   : > { %v636_v8 = vmax.f32 %v634_v7, 0.0 }
 0x19e   : > { %v640_v9 = vadd.f32 1e-07, %v636_v8 }
 0x1a0   : > { %969 = vrsqrt.f32 %v640_v9 }
 0x1a7   : > { %v968_v11 = vpop.eup %967 }
 0x1a8   : > { %v643_v13 = vmul.f32 %v968_v11, %v637_v10 }
 0x1aa   : > { %v652_v15 = vmul.f32 %v832_v12, %v643_v13 }
 0x1ac   : > { %v661_v17 = vadd.f32 %v833_v14, %v652_v15 }
 0x1ad   : > { %v970_v18 = vpop.eup %969 }
 0x1ae   : > { %v644_v19 = vmul.f32 %v970_v18, %v638_v16  ;;  %v663_v20 = vmul.f32 %v661_v17, %v1226_v34 }
 0x1b0   : > { %v653_v21 = vmul.f32 %v832_v12, %v644_v19  ;;  %665 = vst.msk [vmem:[%s337_s9] sm:$0xff] %vm415_vm1, %v663_v20 }
 0x1b2   : > { %v662_v22 = vadd.f32 %v833_v14, %v653_v21 }
 0x1b4   : > { %v664_v23 = vmul.f32 %v662_v22, %v601_v43 }
 0x1b6   : > { %666 = vst.msk [vmem:[%s337_s9 + $0x8] sm:$0xff] %vm415_vm1, %v664_v23 }
 0x1b7   : > { %984 = shalt.err (!%p981_p7)
}
 0x1b8   : > { %s985_s10 = scalar_lea.hbm %s1251_s18, 256  ;;  %s989_s9 = scalar_lea.hbm %s1314_s7, 1024 }
 0x1b9   : > { %p986_p9 = scmp.ne.s32.totalorder %s1251_s18, %s985_s10  ;;  %p990_p12 = scmp.lt.s32.totalorder %s1251_s18, %s1314_s7 }
 0x1ba   : > { %p991_p13 = scmp.lt.s32.totalorder %s989_s9, %s985_s10 }
 0x1bb   : > { %p987_p10 = pnand %p986_p9, %p1162_p3 }
 0x1bc   : > { %p992_p0 = por %p991_p13, %p990_p12 }
 0x1bd   : > { %p988_p11 = pneg %p987_p10 }
 0x1bf   : > { %p993_p1 = pnand %p992_p0, %p988_p11 }
 0x1c1   : > { %996 = shalt.err (!%p993_p1)
}
 0x1c2   : > { %s1069_s12 = smov 128   ;;  %s1070_s13 = smov 8  }
 0x1c3   : > { %878 = dma.vmem_to_hbm [thread:$0]  (%p1162_p3), %s1253_s28, 256, %s1251_s18, %s1256_s23, %s1069_s12, %s1069_s12, %s1070_s13  }
 0x1c4 PF: > { %p884_p2 = scmp.ge.s32.totalorder %s1063_s8, 2  ;;  %s698_s16 = sand.u32 1, %s1035_s24  }
 0x1c5   : > { %s699_s17 = scalar_lea.sflag [#allocation3], %s698_s16 }
 0x1c6   : > { %p881_p4 = pnand %p884_p2, %p1171_p8 }
 0x1c8   : > { %p882_p5 = pneg %p881_p4 }
 0x1ca   : > { %1030 = dma.done.wait (%p882_p5), %s699_s17, 256  }
 0x1cb   : > { %1032 = vsyncadd (%p882_p5), %s699_s17, 4294967040  ;;  %s20_s8 = sadd.s32 1, %s1063_s8   ;;  %s1319_s14 = sld [smem:[#allocation5_spill]] }
 0x1cc   : > { %p17_p6 = scmp.ge.s32.totalorder %s20_s8, 6   ;;  %s1320_s24 = smov %s1039_s25 }
 0x1cd   : > { %s1321_s25 = smov %s1043_s26  ;;  %s1322_s26 = smov %s1180_s19 }
 0x1ce   : > { %s1323_s27 = smov %s1055_s29  ;;  %s1324_s28 = smov %s1059_s30 }
 0x1cf   : > { %s1325_s29 = smov %s1328_s11  ;;  %19 = sbr.rel (!%p17_p6) target bundleno = 5 (0x5), region = 92 }
 0x1d1   : > { %s1326_s30 = smov %s1319_s14 }
 0x1d4   :  { %704 = vsyncpa [#allocation3], 1 }
 0x1d5   :  { %706 = vsyncpa [#allocation3 + $0x1], 1 }

</bundles_post_ra>
